<compile_context>
chip_gen: v6e
topology: v6e:2x2x1
jax: 0.10.0
libtpu: 0.0.40
codegen_flags: <defaults>
</compile_context>

<pallas_src>
import jax
import jax.numpy as jnp
from jax.experimental import pallas as pl
from jax.experimental.pallas import tpu as pltpu


def _merger_kernel(w_ref, x_ref, o_ref):
    # w_ref: (H, tD), x_ref: (tB, H, tD), o_ref: (tB, tD)
    H = w_ref.shape[0]

    # Softmax over the head axis on the resident (H, tD) weight tile.
    # Exact division (NOT the approx EUP reciprocal — its >1e-3 relative error
    # on non-power-of-two denominators caused the previous correctness failure).
    w = w_ref[...].astype(jnp.float32)
    m = jnp.max(w, axis=0, keepdims=True)
    e = jnp.exp(w - m)
    sm = e / jnp.sum(e, axis=0, keepdims=True)              # (H, tD), f32

    # Running accumulator over the (small) head axis: only one (tB, tD) f32
    # slab live at a time instead of a full (tB, H, tD) f32 product.
    acc = x_ref[:, 0, :].astype(jnp.float32) * sm[0:1, :]
    for h in range(1, H):
        acc = acc + x_ref[:, h, :].astype(jnp.float32) * sm[h:h + 1, :]

    o_ref[...] = acc.astype(o_ref.dtype)


def _choose_tiles(B, H, D, x_itemsize, tb_pref, td_pref,
                  vmem_budget=12 * 1024 * 1024):
    """Pick (tB, tD): aligned (8 / 128) divisors of B / D, capped by VMEM budget."""

    def divisor_tile(n, align, cap):
        if n % align != 0:
            return n                       # ragged axis -> full-extent block
        cap = max(align, min(cap, n))
        cap = (cap // align) * align
        for t in range(cap, 0, -align):
            if n % t == 0:
                return t
        return n

    tD = divisor_tile(D, 128, td_pref)
    tB = divisor_tile(B, 8, tb_pref)

    def footprint(tb, td):
        # 2 pipeline buffers each for x and out, weight tile double-buffered too.
        return (2 * tb * H * td * x_itemsize) + (2 * tb * td * 4) + (2 * H * td * 4)

    # Shrink tB (then tD) while keeping alignment and divisibility.
    while footprint(tB, tD) > vmem_budget and tB % 16 == 0:
        tB //= 2
    while footprint(tB, tD) > vmem_budget and tD % 256 == 0:
        tD //= 2
    return tB, tD


def merger_forward(x, weight, head, *, tb_pref=512, td_pref=1024):
    """x: (B, head, hidden_dim); weight: (1, head, hidden_dim) or None."""
    if head == 1:
        # torch.squeeze(x, dim=1) — pure reshape glue, no kernel needed.
        return jnp.squeeze(x, axis=1)

    B, H, D = x.shape
    w2d = jnp.reshape(weight, (H, D))
    tB, tD = _choose_tiles(B, H, D, jnp.dtype(x.dtype).itemsize, tb_pref, td_pref)
    nB, nD = B // tB, D // tD

    return pl.pallas_call(
        _merger_kernel,
        out_shape=jax.ShapeDtypeStruct((B, D), x.dtype),
        grid_spec=pl.GridSpec(
            # D-tile outer, batch-tile inner: the weight block index is constant
            # across consecutive batch steps -> weight tile stays VMEM-resident.
            grid=(nD, nB),
            in_specs=[
                pl.BlockSpec((H, tD), lambda d, b: (0, d)),         # weight
                pl.BlockSpec((tB, H, tD), lambda d, b: (b, 0, d)),  # x
            ],
            out_specs=pl.BlockSpec((tB, tD), lambda d, b: (b, d)),
        ),
        compiler_params=pltpu.CompilerParams(
            dimension_semantics=("parallel", "parallel")),
    )(w2d, x)


if __name__ == "__main__":
    # Shapes consistent with the module's forward: (batch, head, hidden_dim).
    batch, head, hidden_dim = 8, 4, 128

    key = jax.random.PRNGKey(0)
    kx, kw, kx2 = jax.random.split(key, 3)
    x = jax.random.normal(kx, (batch, head, hidden_dim), dtype=jnp.float32)

    # Deterministic parameter init matching Merger.__init__: filled with 1.0.
    weight = jnp.ones((1, head, hidden_dim), dtype=jnp.float32)

    out = jax.block_until_ready(merger_forward(x, weight, head))
    ref = jnp.sum(jax.nn.softmax(weight, axis=1) * x, axis=-2)   # (B, D)
    assert out.shape == (batch, hidden_dim)
    assert jnp.allclose(out, ref, atol=1e-4, rtol=1e-4)

    # Multi-block tiled path (grid = (2, 2)) with a non-trivial random weight.
    B2, H2, D2 = 16, 4, 256
    x2 = jax.random.normal(kx2, (B2, H2, D2), dtype=jnp.float32)
    w2 = jax.random.normal(kw, (1, H2, D2), dtype=jnp.float32)
    out2 = jax.block_until_ready(merger_forward(x2, w2, H2, tb_pref=8, td_pref=128))
    ref2 = jnp.sum(jax.nn.softmax(w2, axis=1) * x2, axis=-2)
    assert out2.shape == (B2, D2)
    assert jnp.allclose(out2, ref2, atol=1e-4, rtol=1e-4)

    # head == 1 path (glue, no kernel).
    x1 = jax.random.normal(kx, (batch, 1, hidden_dim), dtype=jnp.float32)
    out1 = jax.block_until_ready(merger_forward(x1, None, 1))
    assert out1.shape == (batch, hidden_dim)
    assert jnp.allclose(out1, x1[:, 0, :])

    print("KERNEL_OK")
</pallas_src>

<mosaic_0001>
module attributes {stable_mosaic.version = 11 : i64} {
  func.func @_merger_kernel(%arg0: i32, %arg1: i32, %arg2: memref<4x128xf32, #tpu.memory_space<vmem>>, %arg3: memref<8x4x128xf32, #tpu.memory_space<vmem>>, %arg4: memref<8x128xf32, #tpu.memory_space<vmem>>) attributes {dimension_semantics = [#tpu.dimension_semantics<parallel>, #tpu.dimension_semantics<parallel>], iteration_bounds = array<i64: 1, 1>, scalar_prefetch = 0 : i64, scratch_operands = 0 : i64, tpu.core_type = #tpu.core_type<tc>, window_params = [{transform_indices = @transform_0, window_bounds = array<i64: 4, 128>}, {transform_indices = @transform_1, window_bounds = array<i64: 8, 4, 128>}, {transform_indices = @transform_2, window_bounds = array<i64: 8, 128>}]} {
    %c0 = arith.constant 0 : index
    %c0_0 = arith.constant 0 : index
    %0 = vector.load %arg2[%c0, %c0_0] : memref<4x128xf32, #tpu.memory_space<vmem>>, vector<4x128xf32>
    %cst = arith.constant dense<0xFF800000> : vector<128xf32>
    %1 = vector.multi_reduction <maximumf>, %0, %cst [0] : vector<4x128xf32> to vector<128xf32>
    %2 = vector.shape_cast %1 : vector<128xf32> to vector<1x128xf32>
    %3 = vector.broadcast %2 : vector<1x128xf32> to vector<4x128xf32>
    %4 = arith.subf %0, %3 : vector<4x128xf32>
    %5 = math.exp %4 : vector<4x128xf32>
    %cst_1 = arith.constant dense<0.000000e+00> : vector<128xf32>
    %6 = vector.multi_reduction <add>, %5, %cst_1 [0] : vector<4x128xf32> to vector<128xf32>
    %7 = vector.shape_cast %6 : vector<128xf32> to vector<1x128xf32>
    %8 = vector.broadcast %7 : vector<1x128xf32> to vector<4x128xf32>
    %9 = arith.divf %5, %8 : vector<4x128xf32>
    %c0_2 = arith.constant 0 : index
    %c0_3 = arith.constant 0 : index
    %c0_4 = arith.constant 0 : index
    %10 = vector.load %arg3[%c0_2, %c0_3, %c0_4] : memref<8x4x128xf32, #tpu.memory_space<vmem>>, vector<8x1x128xf32>
    %11 = vector.shape_cast %10 : vector<8x1x128xf32> to vector<8x128xf32>
    %12 = vector.extract_strided_slice %9 {offsets = [0, 0], sizes = [1, 128], strides = [1, 1]} : vector<4x128xf32> to vector<1x128xf32>
    %13 = vector.broadcast %12 : vector<1x128xf32> to vector<8x128xf32>
    %14 = arith.mulf %11, %13 : vector<8x128xf32>
    %c0_5 = arith.constant 0 : index
    %c1 = arith.constant 1 : index
    %c0_6 = arith.constant 0 : index
    %15 = vector.load %arg3[%c0_5, %c1, %c0_6] : memref<8x4x128xf32, #tpu.memory_space<vmem>>, vector<8x1x128xf32>
    %16 = vector.shape_cast %15 : vector<8x1x128xf32> to vector<8x128xf32>
    %17 = vector.extract_strided_slice %9 {offsets = [1, 0], sizes = [1, 128], strides = [1, 1]} : vector<4x128xf32> to vector<1x128xf32>
    %18 = vector.broadcast %17 : vector<1x128xf32> to vector<8x128xf32>
    %19 = arith.mulf %16, %18 : vector<8x128xf32>
    %20 = arith.addf %14, %19 : vector<8x128xf32>
    %c0_7 = arith.constant 0 : index
    %c2 = arith.constant 2 : index
    %c0_8 = arith.constant 0 : index
    %21 = vector.load %arg3[%c0_7, %c2, %c0_8] : memref<8x4x128xf32, #tpu.memory_space<vmem>>, vector<8x1x128xf32>
    %22 = vector.shape_cast %21 : vector<8x1x128xf32> to vector<8x128xf32>
    %23 = vector.extract_strided_slice %9 {offsets = [2, 0], sizes = [1, 128], strides = [1, 1]} : vector<4x128xf32> to vector<1x128xf32>
    %24 = vector.broadcast %23 : vector<1x128xf32> to vector<8x128xf32>
    %25 = arith.mulf %22, %24 : vector<8x128xf32>
    %26 = arith.addf %20, %25 : vector<8x128xf32>
    %c0_9 = arith.constant 0 : index
    %c3 = arith.constant 3 : index
    %c0_10 = arith.constant 0 : index
    %27 = vector.load %arg3[%c0_9, %c3, %c0_10] : memref<8x4x128xf32, #tpu.memory_space<vmem>>, vector<8x1x128xf32>
    %28 = vector.shape_cast %27 : vector<8x1x128xf32> to vector<8x128xf32>
    %29 = vector.extract_strided_slice %9 {offsets = [3, 0], sizes = [1, 128], strides = [1, 1]} : vector<4x128xf32> to vector<1x128xf32>
    %30 = vector.broadcast %29 : vector<1x128xf32> to vector<8x128xf32>
    %31 = arith.mulf %28, %30 : vector<8x128xf32>
    %32 = arith.addf %26, %31 : vector<8x128xf32>
    %c0_11 = arith.constant 0 : index
    %c0_12 = arith.constant 0 : index
    %33 = vector.load %arg4[%c0_11, %c0_12] : memref<8x128xf32, #tpu.memory_space<vmem>>, vector<8x128xf32>
    tpu.vector_store %arg4[%c0_11, %c0_12], %32 {strides = array<i32>} : memref<8x128xf32, #tpu.memory_space<vmem>>, vector<8x128xf32>,
    return
  }
  func.func @transform_0(%arg0: i32, %arg1: i32) -> (i32, i32) {
    %c0_i32 = arith.constant 0 : i32
    %c0_i32_0 = arith.constant 0 : i32
    return %c0_i32, %arg0 : i32, i32
  }
  func.func @transform_1(%arg0: i32, %arg1: i32) -> (i32, i32, i32) {
    %c0_i32 = arith.constant 0 : i32
    %c0_i32_0 = arith.constant 0 : i32
    return %arg1, %c0_i32, %arg0 : i32, i32, i32
  }
  func.func @transform_2(%arg0: i32, %arg1: i32) -> (i32, i32) {
    %c0_i32 = arith.constant 0 : i32
    return %arg1, %arg0 : i32, i32
  }
}

</mosaic_0001>

<bundles_post_ra>
// kernel: tpu_custom_call.1
= control target key start
LH: loop header
LB: loop body
LE: loop exit
PB: predicated region body
PF: predicated region fallthrough
CT: control target
= control target key end

     0   :  { %7 = vsyncpa [#allocation3], 0  ;;  %s325_s0 = inlined_call_operand.hbm [shape: f32[4,128], index: 0, kind: input, shape index: {}]   ;;  %s326_s1 = inlined_call_operand.hbm [shape: f32[8,4,128], index: 1, kind: input, shape index: {}]   ;;  %s327_s2 = inlined_call_operand.hbm [shape: f32[8,128], index: 2, kind: output, shape index: {}]  }
   0x1   :  { %8 = vsyncpa [#allocation6], 0 }
   0x2   :  { %9 = vsyncpa [#allocation4], 0  ;;  %s285_s9 = smov [#allocation2]   ;;  %s286_s11 = smov [#allocation5]  }
   0x3   :  { %s16_s10 = sshll.u32 %s285_s9, 4  ;;  %s25_s12 = sshll.u32 %s286_s11, 4  ;;  %s17_s10 = int_to_ptr.vmem [resolvable:$true] %s16_s10  ;;  %s26_s12 = int_to_ptr.vmem [resolvable:$true] %s25_s12 }
   0x4   :  { %s227_s13 = scalar_lea.vmem %s17_s10, 64  ;;  %p232_p1 = scmp.lt.s32.totalorder %s17_s10, %s17_s10 }
   0x5   :  { %p228_p0 = scmp.ne.s32.totalorder %s17_s10, %s227_s13  ;;  %p233_p2 = scmp.lt.s32.totalorder %s227_s13, %s227_s13 }
   0x7   :  { %p234_p3 = por %p233_p2, %p232_p1 }
   0x9   :  { %p235_p4 = pnand %p234_p3, %p228_p0 }
   0xb   :  { %238 = shalt.err (!%p235_p4)
}
   0xc   :  { %19 = dma.hbm_to_vmem [thread:$0]  %s325_s0, 64, %s17_s10, [#allocation3]  }
   0xd   :  { %s247_s16 = scalar_lea.vmem %s26_s12, 512  ;;  %p252_p6 = scmp.lt.s32.totalorder %s26_s12, %s26_s12 }
   0xe   :  { %p248_p5 = scmp.ne.s32.totalorder %s26_s12, %s247_s16  ;;  %p253_p7 = scmp.lt.s32.totalorder %s247_s16, %s247_s16 }
  0x10   :  { %p254_p8 = por %p253_p7, %p252_p6 }
  0x12   :  { %p255_p9 = pnand %p254_p8, %p248_p5 }
  0x14   :  { %258 = shalt.err (!%p255_p9)
}
  0x15   :  { %s287_s17 = smov 64   ;;  %s288_s18 = smov 4  }
  0x16   :  { %31 = dma.hbm_to_vmem [thread:$0]  %s326_s1, 512, %s26_s12, [#allocation6], %s287_s17, %s287_s17, %s288_s18  }
  0x17   :  { %279 = dma.done.wait [#allocation3], 64  }
  0x18   :  { %280 = vsyncadd [#allocation3], 4294967232 }
  0x19   :  { %281 = dma.done.wait [#allocation6], 512  }
  0x1a   :  { %282 = vsyncadd [#allocation6], 4294966784  ;;  %vm39_vm0 = vcmask 1043456   ;;  %v38_v0 = vld [vmem:[#allocation2] sm:$0xf]  ;;  %v67_v18 = vlaneseq  ;;  %vm172_vm1 = vcmask 1041409  }
  0x1b   :  { %v40_v1 = vsel %vm39_vm0, %v38_v0, -inf  ;;  %v59_v23 = vld [vmem:[#allocation5] sm:$0x1]  ;;  %v60_v27 = vld [vmem:[#allocation5 + $0x4] sm:$0x1]  ;;  %vm175_vm2 = vcmask 1042434  }
  0x1c   :  { %v41_v2 = vrot.slane %v40_v1, 4  ;;  %v68_v19 = vshrl.u32 %v67_v18, 7  ;;  %v61_v28 = vld [vmem:[#allocation5 + $0x8] sm:$0x1]  ;;  %v62_v29 = vld [vmem:[#allocation5 + $0xc] sm:$0x1] }
  0x1d   :  { %v63_v30 = vld [vmem:[#allocation5 + $0x10] sm:$0x1]  ;;  %v64_v31 = vld [vmem:[#allocation5 + $0x14] sm:$0x1]  ;;  %v65_v32 = vld [vmem:[#allocation5 + $0x18] sm:$0x1] }
  0x1e   :  { %v42_v3 = vmax.f32 %v40_v1, %v41_v2  ;;  %v69_v20 = vsub.s32 0, %v68_v19  ;;  %v89_v21 = vsub.s32 1, %v68_v19  ;;  %v117_v24 = vsub.s32 2, %v68_v19  ;;  %v66_v33 = vld [vmem:[#allocation5 + $0x1c] sm:$0x1]  ;;  %s289_s0 = smov [#allocation7]  }
  0x1f   :  { %v145_v25 = vsub.s32 3, %v68_v19  ;;  %v79_v35 = vld [vmem:[#allocation5 + $0x1] sm:$0x1]  ;;  %v80_v36 = vld [vmem:[#allocation5 + $0x5] sm:$0x1]  ;;  %vm178_vm3 = vcmask 1043459  }
  0x20   :  { %v43_v4 = vrot.slane %v42_v3, 2  ;;  %v81_v38 = vld [vmem:[#allocation5 + $0x9] sm:$0x1]  ;;  %v82_v39 = vld [vmem:[#allocation5 + $0xd] sm:$0x1]  ;;  %vm181_vm4 = vcmask 1044484  }
  0x21   :  { %v83_v40 = vld [vmem:[#allocation5 + $0x11] sm:$0x1]  ;;  %v84_v47 = vld [vmem:[#allocation5 + $0x15] sm:$0x1]  ;;  %v85_v48 = vld [vmem:[#allocation5 + $0x19] sm:$0x1] }
  0x22   :  { %v44_v5 = vmax.f32 %v42_v3, %v43_v4  ;;  %v86_v49 = vld [vmem:[#allocation5 + $0x1d] sm:$0x1]  ;;  %v107_v58 = vld [vmem:[#allocation5 + $0x2] sm:$0x1]  ;;  %v108_v59 = vld [vmem:[#allocation5 + $0x6] sm:$0x1] }
  0x23   :  { %v110_v1 = vld [vmem:[#allocation5 + $0xe] sm:$0x1]  ;;  %v111_v2 = vld [vmem:[#allocation5 + $0x12] sm:$0x1]  ;;  %v135_v18 = vld [vmem:[#allocation5 + $0x3] sm:$0x1] }
  0x24   :  { %v45_v6 = vrot.slane %v44_v5, 1  ;;  %v136_v19 = vld [vmem:[#allocation5 + $0x7] sm:$0x1]  ;;  %vm184_vm5 = vcmask 1045509   ;;  %vm187_vm6 = vcmask 1046534   ;;  %s200_s1 = sshll.u32 %s289_s0, 4  ;;  %s201_s1 = int_to_ptr.vmem [resolvable:$true] %s200_s1 }
  0x25   :  { %vm190_vm7 = vcmask 1047559   ;;  %s259_s21 = scalar_lea.vmem %s201_s1, 128  ;;  %p264_p11 = scmp.lt.s32.totalorder %s201_s1, %s201_s1 }
  0x26   :  { %v46_v7 = vmax.f32 %v44_v5, %v45_v6  ;;  %p260_p10 = scmp.ne.s32.totalorder %s201_s1, %s259_s21  ;;  %p265_p12 = scmp.lt.s32.totalorder %s259_s21, %s259_s21 }
  0x28   :  { %v47_v8 = vsub.f32 %v38_v0, %v46_v7  ;;  %v109_v0 = vld [vmem:[#allocation5 + $0xa] sm:$0x1]  ;;  %v112_v7 = vld [vmem:[#allocation5 + $0x16] sm:$0x1]  ;;  %p266_p13 = por %p265_p12, %p264_p11 }
  0x2a   :  { %v48_v9 = vmul.f32 1.442695, %v47_v8  ;;  %v113_v8 = vld [vmem:[#allocation5 + $0x1a] sm:$0x1]  ;;  %p267_p0 = pnand %p266_p13, %p260_p10 }
  0x2c   :  { %215 = vpow2.f32 %v48_v9  ;;  %v114_v9 = vld [vmem:[#allocation5 + $0x1e] sm:$0x1] }
  0x39   :  { %v216_v10 = vpop.eup %215 }
  0x3a   :  { %v50_v11 = vsel %vm39_vm0, %v216_v10, 0.0 }
  0x3b   :  { %v51_v12 = vrot.slane %v50_v11, 4 }
  0x3d   :  { %v52_v13 = vadd.f32 %v51_v12, %v50_v11 }
  0x3f   :  { %v53_v14 = vrot.slane %v52_v13, 2 }
  0x41   :  { %v54_v15 = vadd.f32 %v53_v14, %v52_v13 }
  0x43   :  { %v55_v16 = vrot.slane %v54_v15, 1 }
  0x45   :  { %v56_v17 = vadd.f32 %v55_v16, %v54_v15 }
  0x47   :  { %217 = vrcp.f32 %v56_v17 }
  0x54   :  { %v218_v22 = vpop.eup %217 }
  0x55   :  { %v58_v26 = vmul.f32 %v218_v22, %v216_v10 }
  0x57   :  { %v70_v34 = vrot.slane %v58_v26, %v69_v20  ;;  %v90_v37 = vrot.slane %v58_v26, %v89_v21  ;;  %v118_v41 = vrot.slane %v58_v26, %v117_v24  ;;  %v311_v42 = vrot.slane %v58_v26, %v145_v25  ;;  %v137_v24 = vld [vmem:[#allocation5 + $0xb] sm:$0x1]  ;;  %v138_v25 = vld [vmem:[#allocation5 + $0xf] sm:$0x1]  ;;  %v139_v26 = vld [vmem:[#allocation5 + $0x13] sm:$0x1] }
  0x59   :  { %v71_v43 = vmul.f32 %v70_v34, %v59_v23  ;;  %v72_v44 = vmul.f32 %v70_v34, %v60_v27  ;;  %v73_v45 = vmul.f32 %v70_v34, %v61_v28  ;;  %v74_v46 = vmul.f32 %v70_v34, %v62_v29 }
  0x5a   :  { %v75_v50 = vmul.f32 %v70_v34, %v63_v30  ;;  %v76_v51 = vmul.f32 %v70_v34, %v64_v31  ;;  %v77_v52 = vmul.f32 %v70_v34, %v65_v32  ;;  %v78_v53 = vmul.f32 %v70_v34, %v66_v33  ;;  %v140_v31 = vld [vmem:[#allocation5 + $0x17] sm:$0x1]  ;;  %v141_v32 = vld [vmem:[#allocation5 + $0x1b] sm:$0x1]  ;;  %v142_v33 = vld [vmem:[#allocation5 + $0x1f] sm:$0x1] }
  0x5b   :  { %v91_v54 = vmul.f32 %v90_v37, %v79_v35  ;;  %v92_v55 = vmul.f32 %v90_v37, %v80_v36  ;;  %v93_v56 = vmul.f32 %v90_v37, %v81_v38  ;;  %v94_v57 = vmul.f32 %v90_v37, %v82_v39 }
  0x5c   :  { %v95_v60 = vmul.f32 %v90_v37, %v83_v40  ;;  %v96_v61 = vmul.f32 %v90_v37, %v84_v47  ;;  %v97_v62 = vmul.f32 %v90_v37, %v85_v48  ;;  %v98_v63 = vmul.f32 %v90_v37, %v86_v49 }
  0x5d   :  { %v99_v3 = vadd.f32 %v91_v54, %v71_v43  ;;  %v100_v4 = vadd.f32 %v92_v55, %v72_v44  ;;  %v101_v5 = vadd.f32 %v93_v56, %v73_v45  ;;  %v102_v6 = vadd.f32 %v94_v57, %v74_v46 }
  0x5e   :  { %v103_v10 = vadd.f32 %v95_v60, %v75_v50  ;;  %v104_v11 = vadd.f32 %v96_v61, %v76_v51  ;;  %v105_v12 = vadd.f32 %v97_v62, %v77_v52  ;;  %v106_v13 = vadd.f32 %v98_v63, %v78_v53 }
  0x5f   :  { %v119_v14 = vmul.f32 %v118_v41, %v107_v58  ;;  %v120_v15 = vmul.f32 %v118_v41, %v108_v59  ;;  %v121_v16 = vmul.f32 %v118_v41, %v109_v0  ;;  %v122_v17 = vmul.f32 %v118_v41, %v110_v1 }
  0x60   :  { %v123_v20 = vmul.f32 %v118_v41, %v111_v2  ;;  %v124_v21 = vmul.f32 %v118_v41, %v112_v7  ;;  %v125_v22 = vmul.f32 %v118_v41, %v113_v8  ;;  %v126_v23 = vmul.f32 %v118_v41, %v114_v9 }
  0x61   :  { %v127_v27 = vadd.f32 %v119_v14, %v99_v3  ;;  %v128_v28 = vadd.f32 %v120_v15, %v100_v4  ;;  %v129_v29 = vadd.f32 %v121_v16, %v101_v5  ;;  %v130_v30 = vadd.f32 %v122_v17, %v102_v6 }
  0x62   :  { %v131_v34 = vadd.f32 %v123_v20, %v103_v10  ;;  %v132_v35 = vadd.f32 %v124_v21, %v104_v11  ;;  %v133_v36 = vadd.f32 %v125_v22, %v105_v12  ;;  %v134_v37 = vadd.f32 %v126_v23, %v106_v13 }
  0x63   :  { %v147_v38 = vmul.f32 %v311_v42, %v135_v18  ;;  %v148_v39 = vmul.f32 %v311_v42, %v136_v19  ;;  %v149_v40 = vmul.f32 %v311_v42, %v137_v24  ;;  %v150_v41 = vmul.f32 %v311_v42, %v138_v25 }
  0x64   :  { %v151_v43 = vmul.f32 %v311_v42, %v139_v26  ;;  %v152_v44 = vmul.f32 %v311_v42, %v140_v31  ;;  %v153_v45 = vmul.f32 %v311_v42, %v141_v32  ;;  %v154_v46 = vmul.f32 %v311_v42, %v142_v33 }
  0x65   :  { %v155_v47 = vadd.f32 %v147_v38, %v127_v27  ;;  %v156_v48 = vadd.f32 %v148_v39, %v128_v28  ;;  %v157_v49 = vadd.f32 %v149_v40, %v129_v29  ;;  %v158_v50 = vadd.f32 %v150_v41, %v130_v30 }
  0x66   :  { %v159_v51 = vadd.f32 %v151_v43, %v131_v34  ;;  %v160_v52 = vadd.f32 %v152_v44, %v132_v35  ;;  %v161_v53 = vadd.f32 %v153_v45, %v133_v36  ;;  %v162_v54 = vadd.f32 %v154_v46, %v134_v37 }
  0x67   :  { %v171_v55 = vrot.slane %v156_v48, 7  ;;  %v174_v56 = vrot.slane %v157_v49, 6  ;;  %v177_v57 = vrot.slane %v158_v50, 5 }
  0x68   :  { %v180_v58 = vrot.slane %v159_v51, 4  ;;  %v183_v60 = vrot.slane %v160_v52, 3  ;;  %v186_v42 = vrot.slane %v161_v53, 2  ;;  %v189_v63 = vrot.slane %v162_v54, 1 }
  0x69   :  { %v173_v59 = vsel %vm172_vm1, %v171_v55, %v155_v47 }
  0x6a   :  { %v176_v61 = vsel %vm175_vm2, %v174_v56, %v173_v59 }
  0x6b   :  { %v179_v62 = vsel %vm178_vm3, %v177_v57, %v176_v61 }
  0x6c   :  { %v182_v0 = vsel %vm181_vm4, %v180_v58, %v179_v62 }
  0x6d   :  { %v185_v1 = vsel %vm184_vm5, %v183_v60, %v182_v0 }
  0x6e   :  { %v188_v2 = vsel %vm187_vm6, %v186_v42, %v185_v1 }
  0x6f   :  { %v191_v3 = vsel %vm190_vm7, %v189_v63, %v188_v2 }
  0x70   :  { %193 = vst [vmem:[#allocation7] sm:$0xff] %v191_v3 }
  0x71   :  { %270 = shalt.err (!%p267_p0)
}
  0x72   :  { %203 = dma.vmem_to_hbm [thread:$0]  %s201_s1, 128, %s327_s2, [#allocation4]  }
  0x73   :  { %283 = dma.done.wait [#allocation4], 128  }
  0x74   :  { %284 = vsyncadd [#allocation4], 4294967168 }
  0x75   :  { %207 = vsyncpa [#allocation3], 1 }
  0x76   :  { %208 = vsyncpa [#allocation6], 1 }
  0x77   :  { %209 = vsyncpa [#allocation4], 1 }

</bundles_post_ra>
